<compile_context>
chip_gen: v5e
topology: v5e:2x2
jax: 0.10.0
libtpu: 0.0.40
codegen_flags: <defaults>
</compile_context>

<pallas_src>
from functools import partial

import jax
import jax.numpy as jnp
from jax.experimental import pallas as pl
from jax.experimental.pallas import tpu as pltpu


# ----------------------------------------------------------------------------
# Pallas kernel: SharedMLP (1x1 conv with BN-scale folded in, + shift + ReLU)
# followed by max-pool over the nsample axis.
# ----------------------------------------------------------------------------
def _mlp_pool_kernel(nsample, x_ref, *refs):
    out_ref = refs[-1]
    param_refs = refs[:-1]
    n_layers = len(param_refs) // 2

    h = x_ref[0]                                   # (TP*nsample, C_in) bf16
    for l in range(n_layers):
        w = param_refs[2 * l][...]                 # (Cin, Cout) bf16, BN scale folded in
        shift = param_refs[2 * l + 1][...]         # (1, Cout)  f32 folded BN shift
        acc = jnp.dot(h, w, preferred_element_type=jnp.float32)   # MXU, f32 acc
        acc = jnp.maximum(acc + shift, 0.0)        # BN shift + ReLU in f32 (v5e-safe)
        h = acc if l == n_layers - 1 else acc.astype(jnp.bfloat16)

    tp, cout = out_ref.shape[1], out_ref.shape[2]
    h = h.reshape(tp, nsample, cout)
    # NOTE: output block is (TP, Cout); kept non-transposed (known-good lowering).
    # The writeback volume is nsample x smaller than the input stream, so the
    # lane-density of the store is a secondary cost here.
    out_ref[0] = jnp.max(h, axis=1).astype(out_ref.dtype)


def _pad128(c):
    return ((c + 127) // 128) * 128


def _choose_tile_p(P, S, c_in, c_max, budget_bytes=24 << 20):
    """Largest npoint-tile TP (divisor of P) keeping live VMEM under budget.

    Accounts for lane padding to 128 in VMEM: double-buffered bf16 input rows,
    two live f32 activation slabs at the widest layer, double-buffered f32 out.
    Blocks are kept (8,128)-friendly: TP == P or TP % 8 == 0.
    """
    per_point = (S * _pad128(c_in) * 2 * 2          # bf16 input, 2 buffers
                 + S * _pad128(c_max) * 4 * 2       # f32 activations, ~2 live
                 + _pad128(c_max) * 4 * 2)          # f32 output, 2 buffers
    cap = max(1, budget_bytes // per_point)
    best = None
    for tp in range(1, P + 1):
        if P % tp:
            continue
        if tp > cap:
            continue
        if tp != P and tp % 8:
            continue
        best = tp
    return P if best is None else best


def shared_mlp_maxpool(grouped, weights, shifts, *, vmem_limit_bytes=48 << 20):
    """grouped: (B, P, nsample, C_in) bf16 -> (B, P, C_out) f32."""
    B, P, S, C0 = grouped.shape
    Cout = weights[-1].shape[1]
    c_max = max(w.shape[1] for w in weights)
    TP = _choose_tile_p(P, S, C0, c_max)

    x = grouped.reshape(B, P * S, C0)

    in_specs = [pl.BlockSpec((1, TP * S, C0), lambda b, p: (b, p, 0))]
    args = [x]
    for w, sh in zip(weights, shifts):
        in_specs.append(pl.BlockSpec(w.shape, lambda b, p: (0, 0)))
        in_specs.append(pl.BlockSpec(sh.shape, lambda b, p: (0, 0)))
        args += [w, sh]

    return pl.pallas_call(
        partial(_mlp_pool_kernel, S),
        out_shape=jax.ShapeDtypeStruct((B, P, Cout), jnp.float32),
        grid=(B, P // TP),
        in_specs=in_specs,
        out_specs=pl.BlockSpec((1, TP, Cout), lambda b, p: (b, p, 0)),
        compiler_params=pltpu.CompilerParams(
            dimension_semantics=("parallel", "parallel"),
            vmem_limit_bytes=vmem_limit_bytes),
    )(*args)


# ----------------------------------------------------------------------------
# Glue: furthest point sampling, ball query, grouping (data-dependent gathers,
# kept in XLA).
# ----------------------------------------------------------------------------
def furthest_point_sample(xyz, npoint):
    """xyz: (B, N, 3) -> (B, npoint) int32 (matches pointnet2 CUDA FPS)."""
    B, N, _ = xyz.shape

    def fps_one(pts):
        inds = jnp.zeros((npoint,), jnp.int32)
        dist = jnp.full((N,), jnp.inf, jnp.float32)

        def body(i, carry):
            inds, dist = carry
            last = inds[i - 1]
            d = jnp.sum((pts - pts[last]) ** 2, axis=-1)
            dist = jnp.minimum(dist, d)
            inds = inds.at[i].set(jnp.argmax(dist).astype(jnp.int32))
            return inds, dist

        inds, _ = jax.lax.fori_loop(1, npoint, body, (inds, dist))
        return inds

    return jax.vmap(fps_one)(xyz)


def ball_query(radius, nsample, xyz, new_xyz):
    """xyz: (B,N,3), new_xyz: (B,P,3) -> idx (B,P,nsample) int32.
    First nsample in-radius neighbors (in index order); pad with first found."""
    N = xyz.shape[1]
    d2 = jnp.sum((new_xyz[:, :, None, :] - xyz[:, None, :, :]) ** 2, axis=-1)
    within = d2 < radius * radius
    ar = jnp.arange(N, dtype=jnp.int32)
    key = jnp.where(within, ar, ar + N)
    order = jnp.argsort(key, axis=-1)[..., :nsample].astype(jnp.int32)
    cnt = jnp.sum(within, axis=-1, keepdims=True)                 # (B,P,1)
    pos = jnp.arange(nsample, dtype=jnp.int32)
    return jnp.where(pos[None, None, :] < cnt, order, order[..., :1])


def group_points(xyz, new_xyz, features, idx, use_xyz, normalize_xyz, radius,
                 dtype=jnp.bfloat16):
    """Returns grouped (B, P, nsample, 3+C or C) channels-last in `dtype`."""
    grouped_xyz = jnp.take_along_axis(xyz[:, None], idx[..., None], axis=2)
    grouped_xyz = grouped_xyz - new_xyz[:, :, None, :]
    if normalize_xyz:
        grouped_xyz = grouped_xyz / radius
    grouped_xyz = grouped_xyz.astype(dtype)
    feats_nlast = jnp.transpose(features, (0, 2, 1)).astype(dtype)   # (B, N, C)
    grouped_feats = jnp.take_along_axis(feats_nlast[:, None], idx[..., None], axis=2)
    if use_xyz:
        return jnp.concatenate([grouped_xyz, grouped_feats], axis=-1)
    return grouped_feats


# ----------------------------------------------------------------------------
# Full module forward
# ----------------------------------------------------------------------------
def pointnet_sa_module_votes(xyz, features, params, *, npoint, radius, nsample,
                             use_xyz=True, normalize_xyz=False, pooling="max",
                             inds=None):
    assert pooling == "max"
    # TODO(synk): 'avg' / 'rbf' pooling, ret_unique_cnt and sample_uniformly
    # branches are not implemented (module is exercised with pooling='max').
    if inds is None:
        inds = furthest_point_sample(xyz, npoint)                 # (B, npoint)
    new_xyz = jnp.take_along_axis(xyz, inds[..., None], axis=1)   # (B, npoint, 3)
    idx = ball_query(radius, nsample, xyz, new_xyz)               # (B, npoint, nsample)
    grouped = group_points(xyz, new_xyz, features, idx, use_xyz,
                           normalize_xyz, radius, dtype=jnp.bfloat16)

    weights_folded, shifts = params
    new_features = shared_mlp_maxpool(grouped, weights_folded, shifts)  # (B, P, Cout)
    new_features = jnp.transpose(new_features, (0, 2, 1))               # (B, Cout, P)
    return new_xyz, new_features, inds


def init_params(mlp_spec, key):
    """Deterministic Conv2d(1x1, bias=False) weights + eval-mode BatchNorm stats."""
    weights, scales, shifts = [], [], []
    eps = 1e-5
    for i in range(len(mlp_spec) - 1):
        cin, cout = mlp_spec[i], mlp_spec[i + 1]
        key, k1, k2, k3, k4, k5 = jax.random.split(key, 6)
        w = jax.random.normal(k1, (cin, cout), jnp.float32) / jnp.sqrt(float(cin))
        gamma = 1.0 + 0.1 * jax.random.normal(k2, (cout,), jnp.float32)
        beta = 0.1 * jax.random.normal(k3, (cout,), jnp.float32)
        mean = 0.1 * jax.random.normal(k4, (cout,), jnp.float32)
        var = 1.0 + 0.1 * jnp.abs(jax.random.normal(k5, (cout,), jnp.float32))
        scale = gamma / jnp.sqrt(var + eps)
        shift = beta - mean * scale
        weights.append(w)
        scales.append(scale)
        shifts.append(shift)
    return weights, scales, shifts


def fold_bn_params(weights, scales, shifts):
    """Fold BN scale into the conv weights (bf16); keep the shift in f32."""
    w_folded = [(w * sc[None, :]).astype(jnp.bfloat16)
                for w, sc in zip(weights, scales)]
    sh = [s.reshape(1, -1).astype(jnp.float32) for s in shifts]
    return w_folded, sh


def _ref_mlp_maxpool(grouped, weights, scales, shifts):
    h = grouped
    for w, sc, sh in zip(weights, scales, shifts):
        h = jnp.einsum("bpsc,cd->bpsd", h, w, precision=jax.lax.Precision.HIGHEST)
        h = jnp.maximum(h * sc + sh, 0.0)
    return jnp.max(h, axis=2)


if __name__ == "__main__":
    key = jax.random.PRNGKey(0)
    B, N, C = 2, 64, 4
    npoint, radius, nsample = 16, 0.4, 8
    use_xyz, normalize_xyz = True, False

    mlp = [C, 32, 32, 64]
    mlp_spec = list(mlp)
    if use_xyz:
        mlp_spec[0] += 3                                            # 7, 32, 32, 64

    kx, kf, kp = jax.random.split(key, 3)
    xyz = jax.random.uniform(kx, (B, N, 3), jnp.float32)            # points in unit cube
    features = jax.random.normal(kf, (B, C, N), jnp.float32)
    weights, scales, shifts = init_params(mlp_spec, kp)
    kernel_params = fold_bn_params(weights, scales, shifts)

    new_xyz, new_features, inds = pointnet_sa_module_votes(
        xyz, features, kernel_params,
        npoint=npoint, radius=radius, nsample=nsample,
        use_xyz=use_xyz, normalize_xyz=normalize_xyz, pooling="max")
    jax.block_until_ready((new_xyz, new_features, inds))

    assert new_xyz.shape == (B, npoint, 3)
    assert new_features.shape == (B, mlp_spec[-1], npoint)
    assert inds.shape == (B, npoint)

    # Sanity-check the bf16 Pallas hot path against an f32 pure-JAX reference.
    idx = ball_query(radius, nsample, xyz, new_xyz)
    grouped_ref = group_points(xyz, new_xyz, features, idx, use_xyz,
                               normalize_xyz, radius, dtype=jnp.float32)
    ref = jnp.transpose(
        _ref_mlp_maxpool(grouped_ref, weights, scales, shifts), (0, 2, 1))
    assert jnp.allclose(new_features, ref, rtol=5e-2, atol=5e-2), (
        float(jnp.max(jnp.abs(new_features - ref))))

    print("KERNEL_OK")
</pallas_src>

<mosaic_0001>
module attributes {stable_mosaic.version = 11 : i64} {
  func.func @_mlp_pool_kernel(%arg0: i32, %arg1: i32, %arg2: memref<1x128x7xbf16, #tpu.memory_space<vmem>>, %arg3: memref<7x32xbf16, #tpu.memory_space<vmem>>, %arg4: memref<1x32xf32, #tpu.memory_space<vmem>>, %arg5: memref<32x32xbf16, #tpu.memory_space<vmem>>, %arg6: memref<1x32xf32, #tpu.memory_space<vmem>>, %arg7: memref<32x64xbf16, #tpu.memory_space<vmem>>, %arg8: memref<1x64xf32, #tpu.memory_space<vmem>>, %arg9: memref<1x16x64xf32, #tpu.memory_space<vmem>>) attributes {dimension_semantics = [#tpu.dimension_semantics<parallel>, #tpu.dimension_semantics<parallel>], iteration_bounds = array<i64: 2, 1>, scalar_prefetch = 0 : i64, scratch_operands = 0 : i64, tpu.core_type = #tpu.core_type<tc>, window_params = [{transform_indices = @transform_0, window_bounds = array<i64: 1, 128, 7>}, {pipeline_mode = #tpu.pipeline_mode<synchronous>, transform_indices = @transform_1, window_bounds = array<i64: 7, 32>}, {pipeline_mode = #tpu.pipeline_mode<synchronous>, transform_indices = @transform_2, window_bounds = array<i64: 1, 32>}, {pipeline_mode = #tpu.pipeline_mode<synchronous>, transform_indices = @transform_3, window_bounds = array<i64: 32, 32>}, {pipeline_mode = #tpu.pipeline_mode<synchronous>, transform_indices = @transform_4, window_bounds = array<i64: 1, 32>}, {pipeline_mode = #tpu.pipeline_mode<synchronous>, transform_indices = @transform_5, window_bounds = array<i64: 32, 64>}, {pipeline_mode = #tpu.pipeline_mode<synchronous>, transform_indices = @transform_6, window_bounds = array<i64: 1, 64>}, {transform_indices = @transform_7, window_bounds = array<i64: 1, 16, 64>}]} {
    %c0 = arith.constant 0 : index
    %c0_0 = arith.constant 0 : index
    %c0_1 = arith.constant 0 : index
    %0 = vector.load %arg2[%c0, %c0_0, %c0_1] : memref<1x128x7xbf16, #tpu.memory_space<vmem>>, vector<1x128x7xbf16>
    %1 = vector.shape_cast %0 : vector<1x128x7xbf16> to vector<128x7xbf16>
    %c0_2 = arith.constant 0 : index
    %c0_3 = arith.constant 0 : index
    %2 = vector.load %arg3[%c0_2, %c0_3] : memref<7x32xbf16, #tpu.memory_space<vmem>>, vector<7x32xbf16>
    %c0_4 = arith.constant 0 : index
    %c0_5 = arith.constant 0 : index
    %3 = vector.load %arg4[%c0_4, %c0_5] : memref<1x32xf32, #tpu.memory_space<vmem>>, vector<1x32xf32>
    %cst = arith.constant dense<0.000000e+00> : vector<128x32xf32>
    %4 = tpu.matmul %1, %2, %cst {dimension_numbers = #tpu.dot_dimension_numbers<[1], [0], [0], [1], [0, 0, 1, 1], [], []>} : vector<128x7xbf16>, vector<7x32xbf16>, vector<128x32xf32> -> vector<128x32xf32>
    %5 = vector.broadcast %3 : vector<1x32xf32> to vector<128x32xf32>
    %6 = arith.addf %4, %5 : vector<128x32xf32>
    %cst_6 = arith.constant 0.000000e+00 : f32
    %7 = vector.broadcast %cst_6 : f32 to vector<128x32xf32>
    %8 = arith.maximumf %6, %7 : vector<128x32xf32>
    %9 = arith.truncf %8 : vector<128x32xf32> to vector<128x32xbf16>
    %c0_7 = arith.constant 0 : index
    %c0_8 = arith.constant 0 : index
    %10 = vector.load %arg5[%c0_7, %c0_8] : memref<32x32xbf16, #tpu.memory_space<vmem>>, vector<32x32xbf16>
    %c0_9 = arith.constant 0 : index
    %c0_10 = arith.constant 0 : index
    %11 = vector.load %arg6[%c0_9, %c0_10] : memref<1x32xf32, #tpu.memory_space<vmem>>, vector<1x32xf32>
    %cst_11 = arith.constant dense<0.000000e+00> : vector<128x32xf32>
    %12 = tpu.matmul %9, %10, %cst_11 {dimension_numbers = #tpu.dot_dimension_numbers<[1], [0], [0], [1], [0, 0, 1, 1], [], []>} : vector<128x32xbf16>, vector<32x32xbf16>, vector<128x32xf32> -> vector<128x32xf32>
    %13 = vector.broadcast %11 : vector<1x32xf32> to vector<128x32xf32>
    %14 = arith.addf %12, %13 : vector<128x32xf32>
    %cst_12 = arith.constant 0.000000e+00 : f32
    %15 = vector.broadcast %cst_12 : f32 to vector<128x32xf32>
    %16 = arith.maximumf %14, %15 : vector<128x32xf32>
    %17 = arith.truncf %16 : vector<128x32xf32> to vector<128x32xbf16>
    %c0_13 = arith.constant 0 : index
    %c0_14 = arith.constant 0 : index
    %18 = vector.load %arg7[%c0_13, %c0_14] : memref<32x64xbf16, #tpu.memory_space<vmem>>, vector<32x64xbf16>
    %c0_15 = arith.constant 0 : index
    %c0_16 = arith.constant 0 : index
    %19 = vector.load %arg8[%c0_15, %c0_16] : memref<1x64xf32, #tpu.memory_space<vmem>>, vector<1x64xf32>
    %cst_17 = arith.constant dense<0.000000e+00> : vector<128x64xf32>
    %20 = tpu.matmul %17, %18, %cst_17 {dimension_numbers = #tpu.dot_dimension_numbers<[1], [0], [0], [1], [0, 0, 1, 1], [], []>} : vector<128x32xbf16>, vector<32x64xbf16>, vector<128x64xf32> -> vector<128x64xf32>
    %21 = vector.broadcast %19 : vector<1x64xf32> to vector<128x64xf32>
    %22 = arith.addf %20, %21 : vector<128x64xf32>
    %cst_18 = arith.constant 0.000000e+00 : f32
    %23 = vector.broadcast %cst_18 : f32 to vector<128x64xf32>
    %24 = arith.maximumf %22, %23 : vector<128x64xf32>
    %25 = vector.shape_cast %24 : vector<128x64xf32> to vector<16x8x64xf32>
    %cst_19 = arith.constant dense<0xFF800000> : vector<16x64xf32>
    %26 = vector.multi_reduction <maximumf>, %25, %cst_19 [1] : vector<16x8x64xf32> to vector<16x64xf32>
    %c0_20 = arith.constant 0 : index
    %c0_21 = arith.constant 0 : index
    %c0_22 = arith.constant 0 : index
    %27 = vector.load %arg9[%c0_20, %c0_21, %c0_22] : memref<1x16x64xf32, #tpu.memory_space<vmem>>, vector<1x16x64xf32>
    %28 = vector.shape_cast %27 : vector<1x16x64xf32> to vector<16x64xf32>
    %29 = vector.shape_cast %26 : vector<16x64xf32> to vector<1x16x64xf32>
    tpu.vector_store %arg9[%c0_20, %c0_21, %c0_22], %29 {strides = array<i32>} : memref<1x16x64xf32, #tpu.memory_space<vmem>>, vector<1x16x64xf32>,
    return
  }
  func.func @transform_0(%arg0: i32, %arg1: i32) -> (i32, i32, i32) {
    %c0_i32 = arith.constant 0 : i32
    %c0_i32_0 = arith.constant 0 : i32
    return %arg0, %arg1, %c0_i32 : i32, i32, i32
  }
  func.func @transform_1(%arg0: i32, %arg1: i32) -> (i32, i32) {
    %c0_i32 = arith.constant 0 : i32
    %c0_i32_0 = arith.constant 0 : i32
    %c0_i32_1 = arith.constant 0 : i32
    return %c0_i32, %c0_i32_0 : i32, i32
  }
  func.func @transform_2(%arg0: i32, %arg1: i32) -> (i32, i32) {
    %c0_i32 = arith.constant 0 : i32
    %c0_i32_0 = arith.constant 0 : i32
    %c0_i32_1 = arith.constant 0 : i32
    return %c0_i32, %c0_i32_0 : i32, i32
  }
  func.func @transform_3(%arg0: i32, %arg1: i32) -> (i32, i32) {
    %c0_i32 = arith.constant 0 : i32
    %c0_i32_0 = arith.constant 0 : i32
    %c0_i32_1 = arith.constant 0 : i32
    return %c0_i32, %c0_i32_0 : i32, i32
  }
  func.func @transform_4(%arg0: i32, %arg1: i32) -> (i32, i32) {
    %c0_i32 = arith.constant 0 : i32
    %c0_i32_0 = arith.constant 0 : i32
    %c0_i32_1 = arith.constant 0 : i32
    return %c0_i32, %c0_i32_0 : i32, i32
  }
  func.func @transform_5(%arg0: i32, %arg1: i32) -> (i32, i32) {
    %c0_i32 = arith.constant 0 : i32
    %c0_i32_0 = arith.constant 0 : i32
    %c0_i32_1 = arith.constant 0 : i32
    return %c0_i32, %c0_i32_0 : i32, i32
  }
  func.func @transform_6(%arg0: i32, %arg1: i32) -> (i32, i32) {
    %c0_i32 = arith.constant 0 : i32
    %c0_i32_0 = arith.constant 0 : i32
    %c0_i32_1 = arith.constant 0 : i32
    return %c0_i32, %c0_i32_0 : i32, i32
  }
  func.func @transform_7(%arg0: i32, %arg1: i32) -> (i32, i32, i32) {
    %c0_i32 = arith.constant 0 : i32
    %c0_i32_0 = arith.constant 0 : i32
    return %arg0, %arg1, %c0_i32 : i32, i32, i32
  }
}

</mosaic_0001>

<bundles_post_ra>
// kernel: tpu_custom_call.1
= control target key start
LH: loop header
LB: loop body
LE: loop exit
PB: predicated region body
PF: predicated region fallthrough
CT: control target
= control target key end

     0   :  { %12 = vsyncpa [#allocation3], 0  ;;  %s1463_s0 = inlined_call_operand.vmem [shape: bf16[2,128,7], index: 0, kind: input, shape index: {}]   ;;  %s1464_s1 = inlined_call_operand.vmem [shape: bf16[7,32], index: 1, kind: input, shape index: {}]   ;;  %s1465_s2 = inlined_call_operand.vmem [shape: f32[1,32], index: 2, kind: input, shape index: {}]   ;;  %s1466_s3 = inlined_call_operand.vmem [shape: bf16[32,32], index: 3, kind: input, shape index: {}]   ;;  %s1467_s4 = inlined_call_operand.vmem [shape: f32[1,32], index: 4, kind: input, shape index: {}]   ;;  %s1468_s5 = inlined_call_operand.vmem [shape: bf16[32,64], index: 5, kind: input, shape index: {}]   ;;  %s1469_s6 = inlined_call_operand.vmem [shape: f32[1,64], index: 6, kind: input, shape index: {}]   ;;  %s1470_s7 = inlined_call_operand.hbm [shape: f32[2,16,64], index: 7, kind: output, shape index: {}]  }
   0x1   :  { %14 = vsyncpa [#allocation3 + $0x1], 0  ;;  %s1241_s24 = smov 0   ;;  %s1243_s25 = smov 0  }
   0x2   :  { %s1245_s26 = smov 0   ;;  %s1247_s27 = smov 0  }
   0x3   :  { %s1249_s28 = smov 0   ;;  %s1251_s29 = smov 0  }
   0x4 LB: > { %s953_s30 = sadd.s32 4294967295, %s1196_s29   ;;  %s954_s8 = sadd.s32 4294967294, %s1196_s29   ;;  %s1196_s29 = sphi %s1251_s29, %s20_s29   ;;  %s1192_s28 = sphi %s1249_s28, %s1477_s28   ;;  %s1188_s27 = sphi %s1247_s27, %s1476_s27   ;;  %s1184_s26 = sphi %s1245_s26, %s1475_s26   ;;  %s1180_s25 = sphi %s1243_s25, %s1474_s25   ;;  %s1176_s24 = sphi %s1241_s24, %s1473_s24  }
   0x5   : > { %s32_s9 = sadd.s32 1, %s1192_s28  ;;  %s195_s10 = sadd.s32 1, %s1184_s26 }
   0x6   : > { %p34_p0 = scmp.ge.s32.totalorder %s32_s9, 2  ;;  %p205_p1 = scmp.ne.s32.totalorder %s1184_s26, %s1180_s25 }
   0x7   : > { %p206_p2 = scmp.eq.s32.totalorder %s953_s30, 1  ;;  %p211_p3 = scmp.ne.s32.totalorder %s1180_s25, %s1176_s24 }
   0x8   : > { %s1479_s9 = smov (%p34_p0, %s32_s9), 0  ;;  %p212_p5 = scmp.eq.s32.totalorder %s954_s8, 1 }
   0x9   : > { %p1281_p4 = por %p206_p2, %p205_p1  ;;  %s190_s12 = ssub.s32 %s1192_s28, %s1479_s9 }
   0xa   : > { %p957_p6 = scmp.ge.s32.totalorder %s1196_s29, 1  ;;  %p193_p7 = scmp.eq.s32.totalorder %s190_s12, 0 }
   0xb   : > { %p1288_p8 = por %p212_p5, %p211_p3  ;;  %p261_p9 = scmp.lt.s32.totalorder %s1196_s29, 3 }
   0xc   : > { %s1294_s14 = scalar_select %p193_p7, %s1184_s26, %s195_s10  }
   0xd   : > { %p262_p10 = pnand %p957_p6, %p261_p9 }
   0xe   : > { %p298_p11 = scmp.lt.s32.totalorder (!%p262_p10), %s1188_s27, 1  ;;  %s294_s23 = sand.u32 (!%p262_p10), 1, %s1180_s25  }
   0xf   : > { %265 = sbr.rel (%p262_p10) target bundleno = 588 (0x24c), region = 48  ;;  %s958_s30 = sshll.u32 (!%p262_p10), %s294_s23, 4 }
  0x10   : > { %s1398_s8 = scalar_lea.vmem (!%p262_p10), [#allocation2], %s958_s30  ;;  %s1051_s10 = sshll.u32 (!%p262_p10), %s1188_s27, 4 }
  0x11   : > { %s870_s16 = scalar_lea.hbm (!%p262_p10), %s1470_s7, %s1051_s10  ;;  %s1138_s30 = scalar_lea.hbm (!%p262_p10), %s1470_s7, 32 }
  0x14   : > { %v325_v0 = vld [vmem:[%s1464_s1] sm:$0xf]  ;;  %vm395_vm0 = vcmask 1042432   ;;  %vm396_vm1 = vcmask 1043456   ;;  %v1198_v1 = vmov 65535   ;;  %s299_s17 = scalar_select %p298_p11, %s1188_s27, 1 }
  0x15   : > { %v397_v2 = vsel %vm395_vm0, 4294967295, %v1198_v1  ;;  %vm370_vm2 = vcmask 56320   ;;  %v1048_v13 = vld [vmem:[%s1466_s3 + $0x8] sm:$0xff]  ;;  %v1047_v14 = vld [vmem:[%s1466_s3] sm:$0xff]  ;;  %vm495_vm3 = vcmask 261120   ;;  %vm702_vm4 = vcmask 523264  }
  0x16   : > { %v398_v3 = vsel %vm396_vm1, %v397_v2, 0  ;;  %s1038_s18 = sshll.u32 %s299_s17, 6  ;;  %526 = vmatpush.bf16.msra.mxu1 %v1048_v13  ;;  %v1321_v16 = vld [vmem:[%s1465_s2] ss:$0 sm:$0xff]  ;;  %vm831_vm5 = vcmask 1041409   ;;  %vm833_vm6 = vcmask 1042434  }
  0x17   : > { %v400_v4 = vand.u32 %v398_v3, %v325_v0  ;;  %s305_s21 = scalar_lea.vmem %s1463_s0, %s1038_s18  ;;  %v1050_v3 = vld [vmem:[%s1468_s5 + $0x8] sm:$0xff]  ;;  %vm835_vm7 = vcmask 1043459   ;;  %vm837_vm8 = vcmask 1044484   ;;  %vm839_vm9 = vcmask 1045509   ;;  %s871_s17 = sshll.u32 %s1398_s8, 4  ;;  %s872_s17 = int_to_ptr.vmem [resolvable:$true] %s871_s17 }
  0x18   : > { %v1039_v5 = vld [vmem:[%s305_s21] sm:$0xff]  ;;  %v1040_v6 = vld [vmem:[%s305_s21 + $0x8] sm:$0xff]  ;;  %v1041_v7 = vld [vmem:[%s305_s21 + $0x10] sm:$0xff]  ;;  %643 = vmatpush.bf16.msra.mxu2 %v1050_v3  ;;  %vm841_vm10 = vcmask 1046534   ;;  %vm843_vm11 = vcmask 1047559   ;;  %s873_s18 = sshll.u32 %s870_s16, 4  ;;  %s874_s18 = int_to_ptr.hbm [resolvable:$true] %s873_s18 }
  0x19   : > { %409 = vmatpush.bf16.msra.mxu0 %v400_v4  ;;  %1052 = vmatpush.bf16.msra.mxu3 %v400_v4  ;;  %v1042_v8 = vld [vmem:[%s305_s21 + $0x18] sm:$0xff]  ;;  %v1043_v9 = vld [vmem:[%s305_s21 + $0x20] sm:$0xff]  ;;  %v1044_v11 = vld [vmem:[%s305_s21 + $0x28] sm:$0xff]  ;;  %s857_s27 = scalar_lea.sflag [#allocation3], %s294_s23  ;;  %s1132_s19 = sshra.s32 %s874_s18, 4  ;;  %s1133_s19 = int_to_ptr.hbm [resolvable:$true] %s1132_s19 }
  0x1a   : > { %v1046_v10 = vld [vmem:[%s305_s21 + $0x38] sm:$0xff]  ;;  %v1045_v12 = vld [vmem:[%s305_s21 + $0x30] sm:$0xff]  ;;  %527 = vmatpush.bf16.msra.mxu1 %v1047_v14  ;;  %s1134_s20 = scalar_lea.hbm %s1133_s19, 16  ;;  %p1139_p1 = scmp.lt.s32.totalorder %s1133_s19, %s1470_s7 }
  0x1b   : > { %p1135_p12 = scmp.ne.s32.totalorder %s1133_s19, %s1134_s20  ;;  %p1140_p2 = scmp.lt.s32.totalorder %s1138_s30, %s1134_s20 }
  0x1c   : > { %993 = vmatmul.msk.bf16.vlgmr.msra.gmra.mxu0 %vm370_vm2, %v1039_v5  ;;  %1000 = vmatmul.msk.bf16.vlgmr.msra.gmra.mxu3 %vm370_vm2, %v1046_v10 }
  0x1d   : > { %1053 = vmatpush.bf16.msrb.mxu3 %v1048_v13  ;;  %p1136_p13 = pnand %p1135_p12, %p1281_p4  ;;  %p1141_p3 = por %p1140_p2, %p1139_p1 }
  0x1f   : > { %p1137_p0 = pneg %p1136_p13 }
  0x21   : > { %1054 = vmatpush.bf16.msrb.mxu3 %v1047_v14  ;;  %p1142_p5 = pnand %p1141_p3, %p1137_p0 }
  0x25   : > { %1055 = vmatpush.bf16.msra.mxu3 %v1050_v3 }
  0x2c   : > { %994 = vmatmul.msk.bf16.gmra.mxu0 %vm370_vm2, %v1040_v6  ;;  %v1049_v6 = vld [vmem:[%s1468_s5] sm:$0xff] }
  0x2d   : > { %644 = vmatpush.bf16.msra.mxu2 %v1049_v6  ;;  %1056 = vmatpush.bf16.msra.mxu3 %v1049_v6 }
  0x3c   : > { %995 = vmatmul.msk.bf16.gmra.mxu0 %vm370_vm2, %v1041_v7 }
  0x4c   : > { %996 = vmatmul.msk.bf16.gmra.mxu0 %vm370_vm2, %v1042_v8 }
  0x5c   : > { %997 = vmatmul.msk.bf16.gmra.mxu0 %vm370_vm2, %v1043_v9 }
  0x6c   : > { %998 = vmatmul.msk.bf16.gmra.mxu0 %vm370_vm2, %v1044_v11  ;;  %v1116_v11 = vld [vmem:[%s1467_s4] ss:$0 sm:$0xff] }
  0x7c   : > { %999 = vmatmul.msk.bf16.gmra.mxu0 %vm370_vm2, %v1045_v12 }
  0x99   : > { %v411_v15 = vpop.f32.mrf.mxu0 }
  0x9a   : > { %v412_v17 = vadd.f32 %v1321_v16, %v411_v15 }
  0x9c   : > { %v451_v20 = vmax.f32 %v412_v17, 0.0 }
  0x9f   : > { %v446_v61 = vpop.f32.mrf.mxu3 }
  0xa0   : > { %v447_v4 = vadd.f32 %v1321_v16, %v446_v61 }
  0xa1   : > { %v413_v18 = vpop.f32.mrf.mxu0 }
  0xa2   : > { %v414_v19 = vadd.f32 %v1321_v16, %v413_v18  ;;  %v465_v7 = vmax.f32 %v447_v4, 0.0 }
  0xa4   : > { %v452_v21 = vmax.f32 %v414_v19, 0.0 }
  0xa6   : > { %v467_v22 = vpack.c.bf16 %v452_v21, %v451_v20 }
  0xa7   : > { %v448_v2 = vpop.f32.mrf.mxu3 }
  0xa8   : > { %1009 = vmatmul.msk.bf16.vlgmr.msra.gmra.mxu1 %vm495_vm3, %v467_v22  ;;  %v449_v5 = vadd.f32 %v1321_v16, %v448_v2 }
  0xa9   : > { %v416_v23 = vpop.f32.mrf.mxu0 }
  0xaa   : > { %v417_v24 = vadd.f32 %v1321_v16, %v416_v23  ;;  %v466_v8 = vmax.f32 %v449_v5, 0.0 }
  0xac   : > { %v453_v27 = vmax.f32 %v417_v24, 0.0  ;;  %v474_v9 = vpack.c.bf16 %v466_v8, %v465_v7  ;;  %v1367_v7 = vld [vmem:[%s1469_s6] ss:$0 sm:$0xff] }
  0xb1   : > { %v418_v25 = vpop.f32.mrf.mxu0 }
  0xb2   : > { %v419_v26 = vadd.f32 %v1321_v16, %v418_v25 }
  0xb4   : > { %v454_v28 = vmax.f32 %v419_v26, 0.0 }
  0xb6   : > { %v468_v29 = vpack.c.bf16 %v454_v28, %v453_v27 }
  0xb8   : > { %1010 = vmatmul.msk.bf16.gmra.mxu1 %vm495_vm3, %v468_v29 }
  0xb9   : > { %v421_v30 = vpop.f32.mrf.mxu0 }
  0xba   : > { %v422_v31 = vadd.f32 %v1321_v16, %v421_v30 }
  0xbc   : > { %v455_v34 = vmax.f32 %v422_v31, 0.0 }
  0xc1   : > { %v423_v32 = vpop.f32.mrf.mxu0 }
  0xc2   : > { %v424_v33 = vadd.f32 %v1321_v16, %v423_v32 }
  0xc4   : > { %v456_v35 = vmax.f32 %v424_v33, 0.0 }
  0xc6   : > { %v469_v36 = vpack.c.bf16 %v456_v35, %v455_v34 }
  0xc8   : > { %1011 = vmatmul.msk.bf16.gmra.mxu1 %vm495_vm3, %v469_v36 }
  0xc9   : > { %v426_v37 = vpop.f32.mrf.mxu0 }
  0xca   : > { %v427_v38 = vadd.f32 %v1321_v16, %v426_v37 }
  0xcc   : > { %v457_v41 = vmax.f32 %v427_v38, 0.0 }
  0xd1   : > { %v428_v39 = vpop.f32.mrf.mxu0 }
  0xd2   : > { %v429_v40 = vadd.f32 %v1321_v16, %v428_v39 }
  0xd4   : > { %v458_v42 = vmax.f32 %v429_v40, 0.0 }
  0xd6   : > { %v470_v43 = vpack.c.bf16 %v458_v42, %v457_v41 }
  0xd8   : > { %1012 = vmatmul.msk.bf16.gmra.mxu1 %vm495_vm3, %v470_v43 }
  0xd9   : > { %v431_v44 = vpop.f32.mrf.mxu0 }
  0xda   : > { %v432_v45 = vadd.f32 %v1321_v16, %v431_v44 }
  0xdc   : > { %v459_v48 = vmax.f32 %v432_v45, 0.0 }
  0xe1   : > { %v433_v46 = vpop.f32.mrf.mxu0 }
  0xe2   : > { %v434_v47 = vadd.f32 %v1321_v16, %v433_v46 }
  0xe4   : > { %v460_v49 = vmax.f32 %v434_v47, 0.0 }
  0xe6   : > { %v471_v50 = vpack.c.bf16 %v460_v49, %v459_v48 }
  0xe8   : > { %1013 = vmatmul.msk.bf16.gmra.mxu1 %vm495_vm3, %v471_v50 }
  0xe9   : > { %v436_v51 = vpop.f32.mrf.mxu0 }
  0xea   : > { %v437_v52 = vadd.f32 %v1321_v16, %v436_v51 }
  0xec   : > { %v461_v55 = vmax.f32 %v437_v52, 0.0 }
  0xf1   : > { %v438_v53 = vpop.f32.mrf.mxu0 }
  0xf2   : > { %v439_v54 = vadd.f32 %v1321_v16, %v438_v53 }
  0xf4   : > { %v462_v56 = vmax.f32 %v439_v54, 0.0 }
  0xf6   : > { %v472_v57 = vpack.c.bf16 %v462_v56, %v461_v55 }
  0xf8   : > { %1014 = vmatmul.msk.bf16.gmra.mxu1 %vm495_vm3, %v472_v57 }
  0xf9   : > { %v441_v58 = vpop.f32.mrf.mxu0 }
  0xfa   : > { %v442_v59 = vadd.f32 %v1321_v16, %v441_v58 }
  0xfc   : > { %v463_v63 = vmax.f32 %v442_v59, 0.0 }
 0x101   : > { %v443_v60 = vpop.f32.mrf.mxu0 }
 0x102   : > { %v444_v62 = vadd.f32 %v1321_v16, %v443_v60 }
 0x104   : > { %v464_v0 = vmax.f32 %v444_v62, 0.0 }
 0x106   : > { %v473_v1 = vpack.c.bf16 %v464_v0, %v463_v63 }
 0x108   : > { %1015 = vmatmul.msk.bf16.vlgmr.msrb.gmra.mxu3 %vm495_vm3, %v473_v1 }
 0x118   : > { %1016 = vmatmul.msk.bf16.gmra.mxu3 %vm495_vm3, %v474_v9 }
 0x125   : > { %v529_v10 = vpop.f32.mrf.mxu1 }
 0x126   : > { %v530_v12 = vadd.f32 %v1116_v11, %v529_v10 }
 0x128   : > { %v569_v15 = vmax.f32 %v530_v12, 0.0 }
 0x12d   : > { %v531_v13 = vpop.f32.mrf.mxu1 }
 0x12e   : > { %v532_v14 = vadd.f32 %v1116_v11, %v531_v13 }
 0x130   : > { %v570_v16 = vmax.f32 %v532_v14, 0.0 }
 0x132   : > { %v585_v17 = vpack.c.bf16 %v570_v16, %v569_v15 }
 0x134   : > { %1025 = vmatmul.msk.bf16.vlgmr.msra.gmra.mxu2 %vm495_vm3, %v585_v17 }
 0x135   : > { %v534_v18 = vpop.f32.mrf.mxu1 }
 0x136   : > { %v535_v19 = vadd.f32 %v1116_v11, %v534_v18 }
 0x138   : > { %v571_v22 = vmax.f32 %v535_v19, 0.0 }
 0x13d   : > { %v536_v20 = vpop.f32.mrf.mxu1 }
 0x13e   : > { %v537_v21 = vadd.f32 %v1116_v11, %v536_v20 }
 0x140   : > { %v572_v23 = vmax.f32 %v537_v21, 0.0 }
 0x142   : > { %v586_v24 = vpack.c.bf16 %v572_v23, %v571_v22 }
 0x144   : > { %1026 = vmatmul.msk.bf16.gmra.mxu2 %vm495_vm3, %v586_v24 }
 0x145   : > { %v539_v25 = vpop.f32.mrf.mxu1 }
 0x146   : > { %v540_v26 = vadd.f32 %v1116_v11, %v539_v25 }
 0x148   : > { %v573_v29 = vmax.f32 %v540_v26, 0.0 }
 0x14d   : > { %v541_v27 = vpop.f32.mrf.mxu1 }
 0x14e   : > { %v542_v28 = vadd.f32 %v1116_v11, %v541_v27 }
 0x150   : > { %v574_v30 = vmax.f32 %v542_v28, 0.0 }
 0x152   : > { %v587_v31 = vpack.c.bf16 %v574_v30, %v573_v29 }
 0x154   : > { %1027 = vmatmul.msk.bf16.gmra.mxu2 %vm495_vm3, %v587_v31 }
 0x155   : > { %v544_v32 = vpop.f32.mrf.mxu1 }
 0x156   : > { %v545_v33 = vadd.f32 %v1116_v11, %v544_v32 }
 0x158   : > { %v575_v36 = vmax.f32 %v545_v33, 0.0 }
 0x15d   : > { %v546_v34 = vpop.f32.mrf.mxu1 }
 0x15e   : > { %v547_v35 = vadd.f32 %v1116_v11, %v546_v34 }
 0x160   : > { %v576_v37 = vmax.f32 %v547_v35, 0.0 }
 0x162   : > { %v588_v38 = vpack.c.bf16 %v576_v37, %v575_v36 }
 0x164   : > { %1028 = vmatmul.msk.bf16.gmra.mxu2 %vm495_vm3, %v588_v38 }
 0x165   : > { %v549_v39 = vpop.f32.mrf.mxu1 }
 0x166   : > { %v550_v40 = vadd.f32 %v1116_v11, %v549_v39 }
 0x168   : > { %v577_v43 = vmax.f32 %v550_v40, 0.0 }
 0x16d   : > { %v551_v41 = vpop.f32.mrf.mxu1 }
 0x16e   : > { %v552_v42 = vadd.f32 %v1116_v11, %v551_v41 }
 0x170   : > { %v578_v44 = vmax.f32 %v552_v42, 0.0 }
 0x172   : > { %v589_v45 = vpack.c.bf16 %v578_v44, %v577_v43 }
 0x174   : > { %1029 = vmatmul.msk.bf16.gmra.mxu2 %vm495_vm3, %v589_v45 }
 0x175   : > { %v554_v46 = vpop.f32.mrf.mxu1 }
 0x176   : > { %v555_v47 = vadd.f32 %v1116_v11, %v554_v46 }
 0x178   : > { %v579_v50 = vmax.f32 %v555_v47, 0.0 }
 0x17d   : > { %v556_v48 = vpop.f32.mrf.mxu1 }
 0x17e   : > { %v557_v49 = vadd.f32 %v1116_v11, %v556_v48 }
 0x180   : > { %v580_v51 = vmax.f32 %v557_v49, 0.0 }
 0x182   : > { %v590_v52 = vpack.c.bf16 %v580_v51, %v579_v50 }
 0x184   : > { %1030 = vmatmul.msk.bf16.gmra.mxu2 %vm495_vm3, %v590_v52 }
 0x18b   : > { %v559_v53 = vpop.f32.mrf.mxu3 }
 0x18c   : > { %v560_v54 = vadd.f32 %v1116_v11, %v559_v53 }
 0x18e   : > { %v581_v57 = vmax.f32 %v560_v54, 0.0 }
 0x193   : > { %v561_v55 = vpop.f32.mrf.mxu3 }
 0x194   : > { %v562_v56 = vadd.f32 %v1116_v11, %v561_v55 }
 0x196   : > { %v582_v58 = vmax.f32 %v562_v56, 0.0 }
 0x198   : > { %v591_v59 = vpack.c.bf16 %v582_v58, %v581_v57 }
 0x19a   : > { %1031 = vmatmul.msk.bf16.vlgmr.msra.gmra.mxu3 %vm495_vm3, %v591_v59 }
 0x19b   : > { %v564_v60 = vpop.f32.mrf.mxu3 }
 0x19c   : > { %v565_v61 = vadd.f32 %v1116_v11, %v564_v60 }
 0x19e   : > { %v583_v0 = vmax.f32 %v565_v61, 0.0 }
 0x1a3   : > { %v566_v62 = vpop.f32.mrf.mxu3 }
 0x1a4   : > { %v567_v63 = vadd.f32 %v1116_v11, %v566_v62 }
 0x1a6   : > { %v584_v1 = vmax.f32 %v567_v63, 0.0 }
 0x1a8   : > { %v592_v2 = vpack.c.bf16 %v584_v1, %v583_v0 }
 0x1aa   : > { %1032 = vmatmul.msk.bf16.gmra.mxu3 %vm495_vm3, %v592_v2 }
 0x1b7   : > { %v646_v3 = vpop.f32.mrf.mxu2 }
 0x1b8   : > { %v647_v11 = vadd.f32 %v1367_v7, %v646_v3 }
 0x1ba   : > { %v686_v16 = vmax.f32 %v647_v11, 0.0 }
 0x1bc   : > { %v703_v23 = vsel %vm702_vm4, %v686_v16, -inf }
 0x1bd   : > { %v704_v30 = vrot.slane %v703_v23, 4 }
 0x1bf   : > { %v648_v4 = vpop.f32.mrf.mxu2  ;;  %v705_v38 = vmax.f32 %v703_v23, %v704_v30 }
 0x1c0   : > { %v649_v9 = vadd.f32 %v1367_v7, %v648_v4 }
 0x1c1   : > { %v706_v46 = vrot.slane %v705_v38, 2 }
 0x1c2   : > { %v687_v14 = vmax.f32 %v649_v9, 0.0 }
 0x1c3   : > { %v707_v56 = vmax.f32 %v705_v38, %v706_v46 }
 0x1c4   : > { %v710_v20 = vsel %vm702_vm4, %v687_v14, -inf }
 0x1c5   : > { %v711_v26 = vrot.slane %v710_v20, 4  ;;  %v708_v2 = vrot.slane %v707_v56, 1 }
 0x1c7   : > { %v651_v5 = vpop.f32.mrf.mxu2  ;;  %v712_v33 = vmax.f32 %v710_v20, %v711_v26  ;;  %v709_v14 = vmax.f32 %v707_v56, %v708_v2 }
 0x1c8   : > { %v652_v10 = vadd.f32 %v1367_v7, %v651_v5 }
 0x1c9   : > { %v713_v42 = vrot.slane %v712_v33, 2 }
 0x1ca   : > { %v688_v15 = vmax.f32 %v652_v10, 0.0 }
 0x1cb   : > { %v714_v50 = vmax.f32 %v712_v33, %v713_v42 }
 0x1cc   : > { %v717_v22 = vsel %vm702_vm4, %v688_v15, -inf }
 0x1cd   : > { %v718_v28 = vrot.slane %v717_v22, 4  ;;  %v715_v61 = vrot.slane %v714_v50, 1 }
 0x1cf   : > { %v653_v6 = vpop.f32.mrf.mxu2  ;;  %v719_v36 = vmax.f32 %v717_v22, %v718_v28 }
 0x1d0   : > { %v654_v12 = vadd.f32 %v1367_v7, %v653_v6  ;;  %v716_v6 = vmax.f32 %v714_v50, %v715_v61 }
 0x1d1   : > { %v720_v44 = vrot.slane %v719_v36, 2 }
 0x1d2   : > { %v689_v17 = vmax.f32 %v654_v12, 0.0 }
 0x1d3   : > { %v721_v54 = vmax.f32 %v719_v36, %v720_v44 }
 0x1d4   : > { %v724_v24 = vsel %vm702_vm4, %v689_v17, -inf }
 0x1d5   : > { %v725_v31 = vrot.slane %v724_v24, 4  ;;  %v722_v63 = vrot.slane %v721_v54, 1 }
 0x1d7   : > { %v656_v8 = vpop.f32.mrf.mxu2  ;;  %v726_v39 = vmax.f32 %v724_v24, %v725_v31  ;;  %v723_v11 = vmax.f32 %v721_v54, %v722_v63 }
 0x1d8   : > { %v657_v13 = vadd.f32 %v1367_v7, %v656_v8 }
 0x1d9   : > { %v727_v47 = vrot.slane %v726_v39, 2 }
 0x1da   : > { %v690_v18 = vmax.f32 %v657_v13, 0.0 }
 0x1db   : > { %v728_v57 = vmax.f32 %v726_v39, %v727_v47 }
 0x1dc   : > { %v731_v27 = vsel %vm702_vm4, %v690_v18, -inf  ;;  %v832_v18 = vsel %vm831_vm5, %v716_v6, %v709_v14 }
 0x1dd   : > { %v732_v32 = vrot.slane %v731_v27, 4  ;;  %v729_v3 = vrot.slane %v728_v57, 1  ;;  %v834_v22 = vsel %vm833_vm6, %v723_v11, %v832_v18 }
 0x1df   : > { %v658_v19 = vpop.f32.mrf.mxu2  ;;  %v733_v40 = vmax.f32 %v731_v27, %v732_v32  ;;  %v730_v15 = vmax.f32 %v728_v57, %v729_v3 }
 0x1e0   : > { %v659_v21 = vadd.f32 %v1367_v7, %v658_v19 }
 0x1e1   : > { %v734_v49 = vrot.slane %v733_v40, 2  ;;  %v836_v24 = vsel %vm835_vm7, %v730_v15, %v834_v22 }
 0x1e2   : > { %v691_v25 = vmax.f32 %v659_v21, 0.0 }
 0x1e3   : > { %v735_v59 = vmax.f32 %v733_v40, %v734_v49 }
 0x1e4   : > { %v738_v29 = vsel %vm702_vm4, %v691_v25, -inf }
 0x1e5   : > { %v739_v34 = vrot.slane %v738_v29, 4  ;;  %v736_v5 = vrot.slane %v735_v59, 1 }
 0x1e7   : > { %v661_v35 = vpop.f32.mrf.mxu2  ;;  %v740_v43 = vmax.f32 %v738_v29, %v739_v34  ;;  %v737_v17 = vmax.f32 %v735_v59, %v736_v5 }
 0x1e8   : > { %v662_v37 = vadd.f32 %v1367_v7, %v661_v35 }
 0x1e9   : > { %v741_v51 = vrot.slane %v740_v43, 2  ;;  %v838_v26 = vsel %vm837_vm8, %v737_v17, %v836_v24 }
 0x1ea   : > { %v692_v41 = vmax.f32 %v662_v37, 0.0 }
 0x1eb   : > { %v742_v62 = vmax.f32 %v740_v43, %v741_v51 }
 0x1ec   : > { %v745_v45 = vsel %vm702_vm4, %v692_v41, -inf }
 0x1ed   : > { %v746_v48 = vrot.slane %v745_v45, 4  ;;  %v743_v8 = vrot.slane %v742_v62, 1 }
 0x1ef   : > { %v747_v52 = vmax.f32 %v745_v45, %v746_v48  ;;  %v663_v53 = vpop.f32.mrf.mxu2  ;;  %v744_v19 = vmax.f32 %v742_v62, %v743_v8 }
 0x1f0   : > { %v664_v55 = vadd.f32 %v1367_v7, %v663_v53 }
 0x1f1   : > { %v748_v58 = vrot.slane %v747_v52, 2  ;;  %v840_v27 = vsel %vm839_vm9, %v744_v19, %v838_v26 }
 0x1f2   : > { %v693_v60 = vmax.f32 %v664_v55, 0.0 }
 0x1f3   : > { %v749_v0 = vmax.f32 %v747_v52, %v748_v58 }
 0x1f4   : > { %v752_v1 = vsel %vm702_vm4, %v693_v60, -inf }
 0x1f5   : > { %v753_v4 = vrot.slane %v752_v1, 4  ;;  %v750_v12 = vrot.slane %v749_v0, 1 }
 0x1f7   : > { %v754_v9 = vmax.f32 %v752_v1, %v753_v4  ;;  %v666_v10 = vpop.f32.mrf.mxu2  ;;  %v751_v23 = vmax.f32 %v749_v0, %v750_v12 }
 0x1f8   : > { %v667_v13 = vadd.f32 %v1367_v7, %v666_v10 }
 0x1f9   : > { %v755_v16 = vrot.slane %v754_v9, 2  ;;  %v842_v31 = vsel %vm841_vm10, %v751_v23, %v840_v27 }
 0x1fa   : > { %v694_v21 = vmax.f32 %v667_v13, 0.0 }
 0x1fb   : > { %v756_v20 = vmax.f32 %v754_v9, %v755_v16 }
 0x1fc   : > { %v759_v29 = vsel %vm702_vm4, %v694_v21, -inf }
 0x1fd   : > { %v757_v25 = vrot.slane %v756_v20, 1  ;;  %v760_v34 = vrot.slane %v759_v29, 4 }
 0x1ff   : > { %v758_v28 = vmax.f32 %v756_v20, %v757_v25  ;;  %v668_v30 = vpop.f32.mrf.mxu2  ;;  %v761_v38 = vmax.f32 %v759_v29, %v760_v34 }
 0x200   : > { %v669_v32 = vadd.f32 %v1367_v7, %v668_v30 }
 0x201   : > { %v844_v33 = vsel %vm843_vm11, %v758_v28, %v842_v31  ;;  %v762_v43 = vrot.slane %v761_v38, 2 }
 0x202   : > { %v695_v35 = vmax.f32 %v669_v32, 0.0  ;;  %854 = vst.msk [vmem:[%s1398_s8] sm:$0xff] %vm702_vm4, %v844_v33 }
 0x203   : > { %v763_v48 = vmax.f32 %v761_v38, %v762_v43 }
 0x204   : > { %v766_v36 = vsel %vm702_vm4, %v695_v35, -inf }
 0x205   : > { %v767_v37 = vrot.slane %v766_v36, 4  ;;  %v764_v54 = vrot.slane %v763_v48, 1 }
 0x207   : > { %v768_v39 = vmax.f32 %v766_v36, %v767_v37  ;;  %v671_v40 = vpop.f32.mrf.mxu2  ;;  %v765_v61 = vmax.f32 %v763_v48, %v764_v54 }
 0x208   : > { %v672_v41 = vadd.f32 %v1367_v7, %v671_v40 }
 0x209   : > { %v769_v42 = vrot.slane %v768_v39, 2 }
 0x20a   : > { %v696_v44 = vmax.f32 %v672_v41, 0.0 }
 0x20b   : > { %v770_v45 = vmax.f32 %v768_v39, %v769_v42 }
 0x20c   : > { %v773_v46 = vsel %vm702_vm4, %v696_v44, -inf }
 0x20d   : > { %v774_v47 = vrot.slane %v773_v46, 4  ;;  %v771_v51 = vrot.slane %v770_v45, 1 }
 0x20f   : > { %v775_v49 = vmax.f32 %v773_v46, %v774_v47  ;;  %v673_v50 = vpop.f32.mrf.mxu2  ;;  %v772_v57 = vmax.f32 %v770_v45, %v771_v51 }
 0x210   : > { %v674_v52 = vadd.f32 %v1367_v7, %v673_v50 }
 0x211   : > { %v776_v53 = vrot.slane %v775_v49, 2  ;;  %v845_v0 = vsel %vm831_vm5, %v772_v57, %v765_v61 }
 0x212   : > { %v697_v55 = vmax.f32 %v674_v52, 0.0 }
 0x213   : > { %v777_v56 = vmax.f32 %v775_v49, %v776_v53 }
 0x214   : > { %v780_v58 = vsel %vm702_vm4, %v697_v55, -inf }
 0x215   : > { %v778_v59 = vrot.slane %v777_v56, 1  ;;  %v781_v60 = vrot.slane %v780_v58, 4 }
 0x217   : > { %v779_v62 = vmax.f32 %v777_v56, %v778_v59  ;;  %v782_v63 = vmax.f32 %v780_v58, %v781_v60 }
 0x219   : > { %v846_v1 = vsel %vm833_vm6, %v779_v62, %v845_v0  ;;  %v783_v2 = vrot.slane %v782_v63, 2 }
 0x21b   : > { %v784_v3 = vmax.f32 %v782_v63, %v783_v2 }
 0x21d   : > { %v785_v4 = vrot.slane %v784_v3, 1  ;;  %v676_v5 = vpop.f32.mrf.mxu3 }
 0x21e   : > { %v677_v9 = vadd.f32 %v1367_v7, %v676_v5 }
 0x21f   : > { %v786_v6 = vmax.f32 %v784_v3, %v785_v4 }
 0x220   : > { %v698_v10 = vmax.f32 %v677_v9, 0.0 }
 0x221   : > { %v847_v8 = vsel %vm835_vm7, %v786_v6, %v846_v1 }
 0x222   : > { %v787_v14 = vsel %vm702_vm4, %v698_v10, -inf }
 0x223   : > { %v788_v16 = vrot.slane %v787_v14, 4 }
 0x225   : > { %v678_v11 = vpop.f32.mrf.mxu3  ;;  %v789_v20 = vmax.f32 %v787_v14, %v788_v16 }
 0x226   : > { %v679_v12 = vadd.f32 %v1367_v7, %v678_v11 }
 0x227   : > { %v790_v25 = vrot.slane %v789_v20, 2 }
 0x228   : > { %v699_v13 = vmax.f32 %v679_v12, 0.0 }
 0x229   : > { %v791_v31 = vmax.f32 %v789_v20, %v790_v25 }
 0x22a   : > { %v794_v15 = vsel %vm702_vm4, %v699_v13, -inf }
 0x22b   : > { %v795_v17 = vrot.slane %v794_v15, 4  ;;  %v792_v37 = vrot.slane %v791_v31, 1 }
 0x22d   : > { %v681_v18 = vpop.f32.mrf.mxu3  ;;  %v796_v22 = vmax.f32 %v794_v15, %v795_v17 }
 0x22e   : > { %v682_v19 = vadd.f32 %v1367_v7, %v681_v18 }
 0x22f   : > { %v797_v26 = vrot.slane %v796_v22, 2 }
 0x230   : > { %v700_v21 = vmax.f32 %v682_v19, 0.0 }
 0x231   : > { %v798_v33 = vmax.f32 %v796_v22, %v797_v26 }
 0x232   : > { %v801_v23 = vsel %vm702_vm4, %v700_v21, -inf }
 0x233   : > { %v802_v24 = vrot.slane %v801_v23, 4  ;;  %v799_v38 = vrot.slane %v798_v33, 1 }
 0x235   : > { %v803_v27 = vmax.f32 %v801_v23, %v802_v24  ;;  %v683_v28 = vpop.f32.mrf.mxu3  ;;  %v800_v42 = vmax.f32 %v798_v33, %v799_v38 }
 0x236   : > { %v684_v29 = vadd.f32 %v1367_v7, %v683_v28  ;;  %v793_v7 = vmax.f32 %v791_v31, %v792_v37 }
 0x237   : > { %v804_v30 = vrot.slane %v803_v27, 2 }
 0x238   : > { %v701_v32 = vmax.f32 %v684_v29, 0.0  ;;  %v848_v46 = vsel %vm837_vm8, %v793_v7, %v847_v8 }
 0x239   : > { %v805_v34 = vmax.f32 %v803_v27, %v804_v30  ;;  %v849_v47 = vsel %vm839_vm9, %v800_v42, %v848_v46 }
 0x23a   : > { %v808_v35 = vsel %vm702_vm4, %v701_v32, -inf }
 0x23b   : > { %v809_v36 = vrot.slane %v808_v35, 4  ;;  %v806_v40 = vrot.slane %v805_v34, 1 }
 0x23d   : > { %v810_v39 = vmax.f32 %v808_v35, %v809_v36  ;;  %v807_v44 = vmax.f32 %v805_v34, %v806_v40 }
 0x23f   : > { %v811_v41 = vrot.slane %v810_v39, 2  ;;  %v850_v49 = vsel %vm841_vm10, %v807_v44, %v849_v47 }
 0x241   : > { %v812_v43 = vmax.f32 %v810_v39, %v811_v41 }
 0x243   : > { %v813_v45 = vrot.slane %v812_v43, 1 }
 0x245   : > { %v814_v48 = vmax.f32 %v812_v43, %v813_v45 }
 0x247   : > { %v851_v50 = vsel %vm843_vm11, %v814_v48, %v850_v49 }
 0x248   : > { %855 = vst.msk [vmem:[%s1398_s8 + $0x8] sm:$0xff] %vm702_vm4, %v851_v50 }
 0x249   : > { %1145 = shalt.err (!%p1142_p5)
}
 0x24a   : > { %s1199_s23 = smov 128   ;;  %s1200_s8 = smov 8  }
 0x24b   : > { %1057 = dma.vmem_to_hbm [thread:$0]  (%p1281_p4), %s872_s17, 256, %s874_s18, %s857_s27, %s1199_s23, %s1199_s23, %s1200_s8  }
 0x24c PF: > { %p1063_p6 = scmp.ge.s32.totalorder %s1196_s29, 2  ;;  %s888_s15 = sand.u32 1, %s1176_s24  }
 0x24d   : > { %s889_s16 = scalar_lea.sflag [#allocation3], %s888_s15 }
 0x24e   : > { %p1060_p7 = pnand %p1063_p6, %p1288_p8 }
 0x250   : > { %p1061_p9 = pneg %p1060_p7 }
 0x252   : > { %1171 = dma.done.wait (%p1061_p9), %s889_s16, 256  }
 0x253   : > { %1173 = vsyncadd (%p1061_p9), %s889_s16, 4294967040  ;;  %s20_s29 = sadd.s32 1, %s1196_s29   ;;  %s1473_s24 = smov %s1180_s25 }
 0x254   : > { %p17_p10 = scmp.ge.s32.totalorder %s20_s29, 4   ;;  %s1474_s25 = smov %s1184_s26 }
 0x255   : > { %s1475_s26 = smov %s1294_s14  ;;  %s1476_s27 = smov %s1192_s28 }
 0x256   : > { %s1477_s28 = smov %s1479_s9  ;;  %19 = sbr.rel (!%p17_p10) target bundleno = 4 (0x4), region = 83 }
 0x25b   :  { %895 = vsyncpa [#allocation3], 1 }
 0x25c   :  { %897 = vsyncpa [#allocation3 + $0x1], 1 }

</bundles_post_ra>
